<compile_context>
chip_gen: v5e
topology: v5e:2x2
jax: 0.10.0
libtpu: 0.0.40
codegen_flags: <defaults>
</compile_context>

<pallas_src>
import functools

import jax
import jax.numpy as jnp
from jax.experimental import pallas as pl
from jax.experimental.pallas import tpu as pltpu

BN_EPS = 1e-5  # PyTorch BatchNorm2d default eps


# ---------------------------------------------------------------------------
# Kernel 1: depthwise conv (stride 1) + folded BatchNorm + ReLU
#   x_ref : (1, C, Hp, Wp)  padded input, one batch element per grid step
#   w_ref : (1, C, kH, kW)  depthwise taps
#   s_ref : (1, C, 1, 1)    folded BN scale
#   b_ref : (1, C, 1, 1)    folded BN bias
#   o_ref : (1, C, H, W)
# ---------------------------------------------------------------------------
def _dw_bn_relu_kernel(x_ref, w_ref, s_ref, b_ref, o_ref, *, kh, kw, out_h, out_w):
    x = x_ref[...].astype(jnp.float32)   # (1, C, Hp, Wp)
    w = w_ref[...].astype(jnp.float32)   # (1, C, kH, kW)

    acc = None
    # Statically unrolled over the kH*kW taps: each tap is a shifted slice of the
    # padded image times a per-channel scalar -> plain VPU multiply-adds.
    for i in range(kh):
        for j in range(kw):
            term = x[:, :, i:i + out_h, j:j + out_w] * w[:, :, i:i + 1, j:j + 1]
            acc = term if acc is None else acc + term

    y = acc * s_ref[...].astype(jnp.float32) + b_ref[...].astype(jnp.float32)
    o_ref[...] = jnp.maximum(y, 0.0).astype(o_ref.dtype)


# ---------------------------------------------------------------------------
# Kernel 2: 1x1 conv (with BN2 folded into the weights) + bias + ReLU
#   m_ref : (1, C_in, T)   lane-dense spatial tile
#   w_ref : (C_out, C_in)  BN-scaled pointwise weights
#   b_ref : (C_out, 1)     folded BN bias
#   o_ref : (1, C_out, T)
# ---------------------------------------------------------------------------
def _pw_bn_relu_kernel(m_ref, w_ref, b_ref, o_ref):
    m = m_ref[0].astype(jnp.float32)            # (C_in, T)
    w = w_ref[...].astype(jnp.float32)          # (C_out, C_in)
    y = jnp.dot(w, m, preferred_element_type=jnp.float32)   # MXU: (C_out, T)
    y = y + b_ref[...].astype(jnp.float32)      # (C_out, 1) broadcast over lanes
    o_ref[0] = jnp.maximum(y, 0.0).astype(o_ref.dtype)


def _pick_hw_tile(hw, max_tile=2048):
    """Largest multiple-of-128 tile dividing hw (<= max_tile); full extent otherwise."""
    if hw % 128 != 0:
        return hw  # full-extent block: correct, just not lane-dense
    t = min(hw, max_tile)
    t -= t % 128
    while hw % t != 0:
        t -= 128
    return t


def conv2d_depthwise_forward(x, dw_w, bn1, pw_w, bn2, *, stride=1):
    """Inference forward of Conv2dDepthWise.

    x    : (N, C_in, H, W)
    dw_w : (C_in, 1, kH, kW)   depthwise conv weights (PyTorch layout)
    pw_w : (C_out, C_in, 1, 1) pointwise conv weights
    bn1, bn2 : dicts with keys gamma, beta, mean, var (per-channel)
    """
    N, C_in, H, W = x.shape
    assert dw_w.shape[0] == C_in and dw_w.shape[1] == 1
    kh, kw = int(dw_w.shape[2]), int(dw_w.shape[3])
    # TODO(synk): stride > 1 depthwise path (strided window) not implemented.
    assert stride == 1, "only stride=1 implemented"
    pad_h, pad_w = kh // 2, kw // 2        # matches int(kernel_size / 2) in the module
    out_h = H + 2 * pad_h - kh + 1
    out_w = W + 2 * pad_w - kw + 1
    C_out = pw_w.shape[0]

    # ---- Fold BatchNorms (inference semantics) in the wrapper --------------
    s1 = bn1["gamma"] / jnp.sqrt(bn1["var"] + BN_EPS)
    b1 = bn1["beta"] - bn1["mean"] * s1
    s2 = bn2["gamma"] / jnp.sqrt(bn2["var"] + BN_EPS)
    b2 = bn2["beta"] - bn2["mean"] * s2
    pw_folded = pw_w.reshape(C_out, C_in) * s2[:, None]      # BN2 scale folded into weights

    Hp, Wp = H + 2 * pad_h, W + 2 * pad_w
    x_pad = jnp.pad(x, ((0, 0), (0, 0), (pad_h, pad_h), (pad_w, pad_w)))

    dw4 = dw_w.reshape(1, C_in, kh, kw)
    s1_4 = s1.reshape(1, C_in, 1, 1)
    b1_4 = b1.reshape(1, C_in, 1, 1)

    # ---- Kernel 1: depthwise + BN + ReLU, one batch element per grid step --
    dw_kernel = functools.partial(
        _dw_bn_relu_kernel, kh=kh, kw=kw, out_h=out_h, out_w=out_w)
    mid = pl.pallas_call(
        dw_kernel,
        out_shape=jax.ShapeDtypeStruct((N, C_in, out_h, out_w), x.dtype),
        grid_spec=pltpu.PrefetchScalarGridSpec(
            num_scalar_prefetch=0,
            grid=(N,),
            in_specs=[
                pl.BlockSpec((1, C_in, Hp, Wp), lambda n: (n, 0, 0, 0)),
                pl.BlockSpec((1, C_in, kh, kw), lambda n: (0, 0, 0, 0)),
                pl.BlockSpec((1, C_in, 1, 1), lambda n: (0, 0, 0, 0)),
                pl.BlockSpec((1, C_in, 1, 1), lambda n: (0, 0, 0, 0)),
            ],
            out_specs=pl.BlockSpec((1, C_in, out_h, out_w), lambda n: (n, 0, 0, 0)),
        ),
        compiler_params=pltpu.CompilerParams(dimension_semantics=("parallel",)),
    )(x_pad, dw4, s1_4, b1_4)

    # ---- Kernel 2: 1x1 conv (MXU) + BN + ReLU over lane-dense HW tiles -----
    HW = out_h * out_w
    t_hw = _pick_hw_tile(HW)
    mid_flat = mid.reshape(N, C_in, HW)          # free, contiguous reshape in the wrapper
    b2_2 = b2.reshape(C_out, 1)

    out_flat = pl.pallas_call(
        _pw_bn_relu_kernel,
        out_shape=jax.ShapeDtypeStruct((N, C_out, HW), x.dtype),
        grid_spec=pltpu.PrefetchScalarGridSpec(
            num_scalar_prefetch=0,
            grid=(N, HW // t_hw),
            in_specs=[
                pl.BlockSpec((1, C_in, t_hw), lambda n, s: (n, 0, s)),
                pl.BlockSpec((C_out, C_in), lambda n, s: (0, 0)),
                pl.BlockSpec((C_out, 1), lambda n, s: (0, 0)),
            ],
            out_specs=pl.BlockSpec((1, C_out, t_hw), lambda n, s: (n, 0, s)),
        ),
        compiler_params=pltpu.CompilerParams(
            dimension_semantics=("parallel", "parallel")),
    )(mid_flat, pw_folded.astype(x.dtype), b2_2.astype(x.dtype))

    return out_flat.reshape(N, C_out, out_h, out_w)


# ---------------------------------------------------------------------------
# Pure-JAX reference (inference-mode BN), for correctness checking.
# ---------------------------------------------------------------------------
def _reference_forward(x, dw_w, bn1, pw_w, bn2, *, stride=1):
    C_in = x.shape[1]
    kh, kw = dw_w.shape[2], dw_w.shape[3]
    pad_h, pad_w = kh // 2, kw // 2

    y = jax.lax.conv_general_dilated(
        x, dw_w, window_strides=(stride, stride),
        padding=[(pad_h, pad_h), (pad_w, pad_w)],
        dimension_numbers=("NCHW", "OIHW", "NCHW"),
        feature_group_count=C_in,
        precision=jax.lax.Precision.HIGHEST)

    def bn(z, p):
        return ((z - p["mean"][None, :, None, None])
                / jnp.sqrt(p["var"] + BN_EPS)[None, :, None, None]
                * p["gamma"][None, :, None, None] + p["beta"][None, :, None, None])

    y = jnp.maximum(bn(y, bn1), 0.0)
    z = jnp.einsum("oc,nchw->nohw", pw_w[:, :, 0, 0], y,
                   precision=jax.lax.Precision.HIGHEST)
    return jnp.maximum(bn(z, bn2), 0.0)


if __name__ == "__main__":
    key = jax.random.PRNGKey(0)
    N, C_in, C_out, H, W, K = 2, 4, 8, 16, 16, 3
    ks = jax.random.split(key, 8)

    x = jax.random.normal(ks[0], (N, C_in, H, W), dtype=jnp.float32)
    dw_w = jax.random.normal(ks[1], (C_in, 1, K, K), dtype=jnp.float32) * 0.3
    pw_w = jax.random.normal(ks[2], (C_out, C_in, 1, 1), dtype=jnp.float32) * 0.3
    bn1 = dict(
        gamma=1.0 + 0.1 * jax.random.normal(ks[3], (C_in,), dtype=jnp.float32),
        beta=0.1 * jax.random.normal(ks[4], (C_in,), dtype=jnp.float32),
        mean=0.1 * jax.random.normal(ks[5], (C_in,), dtype=jnp.float32),
        var=jnp.abs(1.0 + 0.1 * jax.random.normal(ks[6], (C_in,), dtype=jnp.float32)),
    )
    bn2 = dict(
        gamma=1.0 + 0.1 * jax.random.normal(ks[7], (C_out,), dtype=jnp.float32),
        beta=jnp.zeros((C_out,), jnp.float32),
        mean=jnp.zeros((C_out,), jnp.float32),
        var=jnp.ones((C_out,), jnp.float32),
    )

    y = conv2d_depthwise_forward(x, dw_w, bn1, pw_w, bn2, stride=1)
    jax.block_until_ready(y)

    y_ref = _reference_forward(x, dw_w, bn1, pw_w, bn2, stride=1)
    assert y.shape == (N, C_out, H, W)
    err = jnp.max(jnp.abs(y - y_ref))
    assert jnp.allclose(y, y_ref, atol=1e-4, rtol=1e-4), f"max abs err = {err}"

    print("KERNEL_OK")
</pallas_src>

<mosaic_0001>
module attributes {stable_mosaic.version = 11 : i64} {
  func.func @_dw_bn_relu_kernel(%arg0: i32, %arg1: memref<1x4x18x18xf32, #tpu.memory_space<vmem>>, %arg2: memref<1x4x3x3xf32, #tpu.memory_space<vmem>>, %arg3: memref<1x4x1x1xf32, #tpu.memory_space<vmem>>, %arg4: memref<1x4x1x1xf32, #tpu.memory_space<vmem>>, %arg5: memref<1x4x16x16xf32, #tpu.memory_space<vmem>>) attributes {dimension_semantics = [#tpu.dimension_semantics<parallel>], iteration_bounds = array<i64: 2>, scalar_prefetch = 0 : i64, scratch_operands = 0 : i64, tpu.core_type = #tpu.core_type<tc>, window_params = [{transform_indices = @transform_0, window_bounds = array<i64: 1, 4, 18, 18>}, {pipeline_mode = #tpu.pipeline_mode<synchronous>, transform_indices = @transform_1, window_bounds = array<i64: 1, 4, 3, 3>}, {pipeline_mode = #tpu.pipeline_mode<synchronous>, transform_indices = @transform_2, window_bounds = array<i64: 1, 4, 1, 1>}, {pipeline_mode = #tpu.pipeline_mode<synchronous>, transform_indices = @transform_3, window_bounds = array<i64: 1, 4, 1, 1>}, {transform_indices = @transform_4, window_bounds = array<i64: 1, 4, 16, 16>}]} {
    %c0 = arith.constant 0 : index
    %c0_0 = arith.constant 0 : index
    %c0_1 = arith.constant 0 : index
    %c0_2 = arith.constant 0 : index
    %0 = vector.load %arg1[%c0, %c0_0, %c0_1, %c0_2] : memref<1x4x18x18xf32, #tpu.memory_space<vmem>>, vector<1x4x18x18xf32>
    %c0_3 = arith.constant 0 : index
    %c0_4 = arith.constant 0 : index
    %c0_5 = arith.constant 0 : index
    %c0_6 = arith.constant 0 : index
    %1 = vector.load %arg2[%c0_3, %c0_4, %c0_5, %c0_6] : memref<1x4x3x3xf32, #tpu.memory_space<vmem>>, vector<1x4x3x3xf32>
    %2 = vector.extract_strided_slice %0 {offsets = [0, 0, 0, 0], sizes = [1, 4, 16, 16], strides = [1, 1, 1, 1]} : vector<1x4x18x18xf32> to vector<1x4x16x16xf32>
    %3 = vector.extract_strided_slice %1 {offsets = [0, 0, 0, 0], sizes = [1, 4, 1, 1], strides = [1, 1, 1, 1]} : vector<1x4x3x3xf32> to vector<1x4x1x1xf32>
    %4 = vector.broadcast %3 : vector<1x4x1x1xf32> to vector<1x4x16x16xf32>
    %5 = arith.mulf %2, %4 : vector<1x4x16x16xf32>
    %6 = vector.extract_strided_slice %0 {offsets = [0, 0, 0, 1], sizes = [1, 4, 16, 16], strides = [1, 1, 1, 1]} : vector<1x4x18x18xf32> to vector<1x4x16x16xf32>
    %7 = vector.extract_strided_slice %1 {offsets = [0, 0, 0, 1], sizes = [1, 4, 1, 1], strides = [1, 1, 1, 1]} : vector<1x4x3x3xf32> to vector<1x4x1x1xf32>
    %8 = vector.broadcast %7 : vector<1x4x1x1xf32> to vector<1x4x16x16xf32>
    %9 = arith.mulf %6, %8 : vector<1x4x16x16xf32>
    %10 = arith.addf %5, %9 : vector<1x4x16x16xf32>
    %11 = vector.extract_strided_slice %0 {offsets = [0, 0, 0, 2], sizes = [1, 4, 16, 16], strides = [1, 1, 1, 1]} : vector<1x4x18x18xf32> to vector<1x4x16x16xf32>
    %12 = vector.extract_strided_slice %1 {offsets = [0, 0, 0, 2], sizes = [1, 4, 1, 1], strides = [1, 1, 1, 1]} : vector<1x4x3x3xf32> to vector<1x4x1x1xf32>
    %13 = vector.broadcast %12 : vector<1x4x1x1xf32> to vector<1x4x16x16xf32>
    %14 = arith.mulf %11, %13 : vector<1x4x16x16xf32>
    %15 = arith.addf %10, %14 : vector<1x4x16x16xf32>
    %16 = vector.extract_strided_slice %0 {offsets = [0, 0, 1, 0], sizes = [1, 4, 16, 16], strides = [1, 1, 1, 1]} : vector<1x4x18x18xf32> to vector<1x4x16x16xf32>
    %17 = vector.extract_strided_slice %1 {offsets = [0, 0, 1, 0], sizes = [1, 4, 1, 1], strides = [1, 1, 1, 1]} : vector<1x4x3x3xf32> to vector<1x4x1x1xf32>
    %18 = vector.broadcast %17 : vector<1x4x1x1xf32> to vector<1x4x16x16xf32>
    %19 = arith.mulf %16, %18 : vector<1x4x16x16xf32>
    %20 = arith.addf %15, %19 : vector<1x4x16x16xf32>
    %21 = vector.extract_strided_slice %0 {offsets = [0, 0, 1, 1], sizes = [1, 4, 16, 16], strides = [1, 1, 1, 1]} : vector<1x4x18x18xf32> to vector<1x4x16x16xf32>
    %22 = vector.extract_strided_slice %1 {offsets = [0, 0, 1, 1], sizes = [1, 4, 1, 1], strides = [1, 1, 1, 1]} : vector<1x4x3x3xf32> to vector<1x4x1x1xf32>
    %23 = vector.broadcast %22 : vector<1x4x1x1xf32> to vector<1x4x16x16xf32>
    %24 = arith.mulf %21, %23 : vector<1x4x16x16xf32>
    %25 = arith.addf %20, %24 : vector<1x4x16x16xf32>
    %26 = vector.extract_strided_slice %0 {offsets = [0, 0, 1, 2], sizes = [1, 4, 16, 16], strides = [1, 1, 1, 1]} : vector<1x4x18x18xf32> to vector<1x4x16x16xf32>
    %27 = vector.extract_strided_slice %1 {offsets = [0, 0, 1, 2], sizes = [1, 4, 1, 1], strides = [1, 1, 1, 1]} : vector<1x4x3x3xf32> to vector<1x4x1x1xf32>
    %28 = vector.broadcast %27 : vector<1x4x1x1xf32> to vector<1x4x16x16xf32>
    %29 = arith.mulf %26, %28 : vector<1x4x16x16xf32>
    %30 = arith.addf %25, %29 : vector<1x4x16x16xf32>
    %31 = vector.extract_strided_slice %0 {offsets = [0, 0, 2, 0], sizes = [1, 4, 16, 16], strides = [1, 1, 1, 1]} : vector<1x4x18x18xf32> to vector<1x4x16x16xf32>
    %32 = vector.extract_strided_slice %1 {offsets = [0, 0, 2, 0], sizes = [1, 4, 1, 1], strides = [1, 1, 1, 1]} : vector<1x4x3x3xf32> to vector<1x4x1x1xf32>
    %33 = vector.broadcast %32 : vector<1x4x1x1xf32> to vector<1x4x16x16xf32>
    %34 = arith.mulf %31, %33 : vector<1x4x16x16xf32>
    %35 = arith.addf %30, %34 : vector<1x4x16x16xf32>
    %36 = vector.extract_strided_slice %0 {offsets = [0, 0, 2, 1], sizes = [1, 4, 16, 16], strides = [1, 1, 1, 1]} : vector<1x4x18x18xf32> to vector<1x4x16x16xf32>
    %37 = vector.extract_strided_slice %1 {offsets = [0, 0, 2, 1], sizes = [1, 4, 1, 1], strides = [1, 1, 1, 1]} : vector<1x4x3x3xf32> to vector<1x4x1x1xf32>
    %38 = vector.broadcast %37 : vector<1x4x1x1xf32> to vector<1x4x16x16xf32>
    %39 = arith.mulf %36, %38 : vector<1x4x16x16xf32>
    %40 = arith.addf %35, %39 : vector<1x4x16x16xf32>
    %41 = vector.extract_strided_slice %0 {offsets = [0, 0, 2, 2], sizes = [1, 4, 16, 16], strides = [1, 1, 1, 1]} : vector<1x4x18x18xf32> to vector<1x4x16x16xf32>
    %42 = vector.extract_strided_slice %1 {offsets = [0, 0, 2, 2], sizes = [1, 4, 1, 1], strides = [1, 1, 1, 1]} : vector<1x4x3x3xf32> to vector<1x4x1x1xf32>
    %43 = vector.broadcast %42 : vector<1x4x1x1xf32> to vector<1x4x16x16xf32>
    %44 = arith.mulf %41, %43 : vector<1x4x16x16xf32>
    %45 = arith.addf %40, %44 : vector<1x4x16x16xf32>
    %c0_7 = arith.constant 0 : index
    %c0_8 = arith.constant 0 : index
    %c0_9 = arith.constant 0 : index
    %c0_10 = arith.constant 0 : index
    %46 = vector.load %arg3[%c0_7, %c0_8, %c0_9, %c0_10] : memref<1x4x1x1xf32, #tpu.memory_space<vmem>>, vector<1x4x1x1xf32>
    %47 = vector.broadcast %46 : vector<1x4x1x1xf32> to vector<1x4x16x16xf32>
    %48 = arith.mulf %45, %47 : vector<1x4x16x16xf32>
    %c0_11 = arith.constant 0 : index
    %c0_12 = arith.constant 0 : index
    %c0_13 = arith.constant 0 : index
    %c0_14 = arith.constant 0 : index
    %49 = vector.load %arg4[%c0_11, %c0_12, %c0_13, %c0_14] : memref<1x4x1x1xf32, #tpu.memory_space<vmem>>, vector<1x4x1x1xf32>
    %50 = vector.broadcast %49 : vector<1x4x1x1xf32> to vector<1x4x16x16xf32>
    %51 = arith.addf %48, %50 : vector<1x4x16x16xf32>
    %cst = arith.constant 0.000000e+00 : f32
    %52 = vector.broadcast %cst : f32 to vector<1x4x16x16xf32>
    %53 = arith.maximumf %51, %52 : vector<1x4x16x16xf32>
    %c0_15 = arith.constant 0 : index
    %c0_16 = arith.constant 0 : index
    %c0_17 = arith.constant 0 : index
    %c0_18 = arith.constant 0 : index
    %54 = vector.load %arg5[%c0_15, %c0_16, %c0_17, %c0_18] : memref<1x4x16x16xf32, #tpu.memory_space<vmem>>, vector<1x4x16x16xf32>
    tpu.vector_store %arg5[%c0_15, %c0_16, %c0_17, %c0_18], %53 {strides = array<i32>} : memref<1x4x16x16xf32, #tpu.memory_space<vmem>>, vector<1x4x16x16xf32>,
    return
  }
  func.func @transform_0(%arg0: i32) -> (i32, i32, i32, i32) {
    %c0_i32 = arith.constant 0 : i32
    %c0_i32_0 = arith.constant 0 : i32
    %c0_i32_1 = arith.constant 0 : i32
    %c0_i32_2 = arith.constant 0 : i32
    return %arg0, %c0_i32, %c0_i32_0, %c0_i32_1 : i32, i32, i32, i32
  }
  func.func @transform_1(%arg0: i32) -> (i32, i32, i32, i32) {
    %c0_i32 = arith.constant 0 : i32
    %c0_i32_0 = arith.constant 0 : i32
    %c0_i32_1 = arith.constant 0 : i32
    %c0_i32_2 = arith.constant 0 : i32
    %c0_i32_3 = arith.constant 0 : i32
    return %c0_i32, %c0_i32_0, %c0_i32_1, %c0_i32_2 : i32, i32, i32, i32
  }
  func.func @transform_2(%arg0: i32) -> (i32, i32, i32, i32) {
    %c0_i32 = arith.constant 0 : i32
    %c0_i32_0 = arith.constant 0 : i32
    %c0_i32_1 = arith.constant 0 : i32
    %c0_i32_2 = arith.constant 0 : i32
    %c0_i32_3 = arith.constant 0 : i32
    return %c0_i32, %c0_i32_0, %c0_i32_1, %c0_i32_2 : i32, i32, i32, i32
  }
  func.func @transform_3(%arg0: i32) -> (i32, i32, i32, i32) {
    %c0_i32 = arith.constant 0 : i32
    %c0_i32_0 = arith.constant 0 : i32
    %c0_i32_1 = arith.constant 0 : i32
    %c0_i32_2 = arith.constant 0 : i32
    %c0_i32_3 = arith.constant 0 : i32
    return %c0_i32, %c0_i32_0, %c0_i32_1, %c0_i32_2 : i32, i32, i32, i32
  }
  func.func @transform_4(%arg0: i32) -> (i32, i32, i32, i32) {
    %c0_i32 = arith.constant 0 : i32
    %c0_i32_0 = arith.constant 0 : i32
    %c0_i32_1 = arith.constant 0 : i32
    %c0_i32_2 = arith.constant 0 : i32
    return %arg0, %c0_i32, %c0_i32_0, %c0_i32_1 : i32, i32, i32, i32
  }
}

</mosaic_0001>

<bundles_post_ra>
// kernel: tpu_custom_call.1
= control target key start
LH: loop header
LB: loop body
LE: loop exit
PB: predicated region body
PF: predicated region fallthrough
CT: control target
= control target key end

     0   :  { %9 = vsyncpa [#allocation3], 0  ;;  %s1883_s0 = inlined_call_operand.vmem [shape: f32[2,4,18,18], index: 0, kind: input, shape index: {}]   ;;  %s1884_s1 = inlined_call_operand.vmem [shape: f32[1,4,3,3], index: 1, kind: input, shape index: {}]   ;;  %s1885_s2 = inlined_call_operand.vmem [shape: f32[1,4,1,1], index: 2, kind: input, shape index: {}]   ;;  %s1886_s3 = inlined_call_operand.vmem [shape: f32[1,4,1,1], index: 3, kind: input, shape index: {}]   ;;  %s1887_s4 = inlined_call_operand.hbm [shape: f32[2,4,16,16], index: 4, kind: output, shape index: {}]  }
   0x1   :  { %11 = vsyncpa [#allocation3 + $0x1], 0  ;;  %s1311_s15 = smov 0   ;;  %s1313_s16 = smov 0  }
   0x2   :  { %s1315_s17 = smov 0   ;;  %s1317_s18 = smov 0  }
   0x3 LB: > { %s1332_s19 = sadd.s32 4294967295, %s1279_s18   ;;  %s1077_s20 = sadd.s32 4294967294, %s1279_s18   ;;  %s1279_s18 = sphi %s1317_s18, %s1893_s18   ;;  %s1275_s17 = sphi %s1315_s17, %s1892_s17   ;;  %s1271_s16 = sphi %s1313_s16, %s1891_s16   ;;  %s1267_s15 = sphi %s1311_s15, %s1890_s15  }
   0x4   : > { %s1336_s21 = sadd.s32 1, %s1279_s18   ;;  %s113_s22 = sadd.s32 1, %s1275_s17 }
   0x5   : > { %s110_s23 = ssub.s32 %s1279_s18, %s1336_s21  ;;  %p123_p0 = scmp.ne.s32.totalorder %s1275_s17, %s1271_s16 }
   0x6   : > { %p111_p1 = scmp.eq.s32.totalorder %s110_s23, 0  ;;  %p124_p2 = scmp.eq.s32.totalorder %s1332_s19, 1 }
   0x7   : > { %p129_p3 = scmp.ne.s32.totalorder %s1271_s16, %s1267_s15  ;;  %p130_p4 = scmp.eq.s32.totalorder %s1077_s20, 1 }
   0x8   : > { %s1347_s24 = scalar_select %p111_p1, %s1275_s17, %s113_s22  }
   0x9   : > { %p1349_p5 = por %p124_p2, %p123_p0  ;;  %p1353_p6 = por %p130_p4, %p129_p3 }
   0xa   : > { %p1080_p7 = scmp.ge.s32.totalorder %s1279_s18, 1  ;;  %p165_p8 = scmp.lt.s32.totalorder %s1279_s18, 3 }
   0xc   : > { %p166_p9 = pnand %p1080_p7, %p165_p8 }
   0xd   : > { %s1281_s5 = smov (!%p166_p9), 127   ;;  %s1282_s10 = smov (!%p166_p9), 126  }
   0xe   : > { %169 = sbr.rel (%p166_p9) target bundleno = 464 (0x1d0), region = 36  ;;  %p191_p10 = scmp.lt.s32.totalorder (!%p166_p9), %s1332_s19, 1 }
  0x13   : > { %v208_v0 = vld [vmem:[%s1884_s1] sm:$0x7]  ;;  %v210_v1 = vld [vmem:[%s1884_s1 + $0x8] sm:$0x7]  ;;  %v209_v2 = vld [vmem:[%s1884_s1 + $0x4] sm:$0x7] }
  0x14   : > { %236 = vrot.lane.b32.xlu0 %v208_v0, %s1281_s5  ;;  %240 = vrot.lane.b32.xlu1 %v210_v1, %s1281_s5  ;;  %1090 = vpush %v208_v0  ;;  %v211_v3 = vld [vmem:[%s1884_s1 + $0xc] sm:$0x7]  ;;  %v374_v4 = vrot.slane %v210_v1, 1  ;;  %v373_v5 = vrot.slane %v209_v2, 1  ;;  %v372_v6 = vrot.slane %v208_v0, 1  ;;  %v1384_v7 = vrot.slane %v209_v2, 2 }
  0x15   : > { %308 = vrot.lane.b32.xlu2 %v210_v1, %s1282_s10  ;;  %1092 = vpush %v209_v2  ;;  %v375_v8 = vrot.slane %v211_v3, 1  ;;  %v1388_v9 = vrot.slane %v208_v0, 2  ;;  %v1395_v10 = vrot.slane %v211_v3, 2  ;;  %v1402_v11 = vrot.slane %v210_v1, 2  ;;  %s192_s11 = scalar_select %p191_p10, %s1332_s19, 1 }
  0x16   : > { %1094 = vpush %v210_v1  ;;  %vm412_vm0 = vcmask 1046528   ;;  %vm681_vm1 = vcmask 1045504   ;;  %vm990_vm2 = vcmask 130048  }
  0x17   : > { %1096 = vpush %v211_v3  ;;  %s1089_s12 = smul.u32 96, %s192_s11 }
  0x19   : > { %s1420_s23 = scalar_lea.vmem %s1883_s0, %s1089_s12 }
  0x1a   : > { %v1427_v27 = vld [vmem:[%s1420_s23] sm:$0xff]  ;;  %v1432_v33 = vld [vmem:[%s1420_s23 + $0x18] sm:$0xff]  ;;  %v1438_v35 = vld [vmem:[%s1420_s23 + $0x8] sm:$0xff] }
  0x1b   : > { %v1435_v34 = vld [vmem:[%s1420_s23 + $0x20] sm:$0xff]  ;;  %v1454_v44 = vld [vmem:[%s1420_s23 + $0x38] sm:$0xff]  ;;  %v1457_v45 = vld [vmem:[%s1420_s23 + $0x48] sm:$0xff] }
  0x1c   : > { %238 = vrot.lane.b32.xlu0 %v209_v2, %s1281_s5  ;;  %242 = vrot.lane.b32.xlu1 %v211_v3, %s1281_s5  ;;  %v1460_v47 = vld [vmem:[%s1420_s23 + $0x30] sm:$0xff]  ;;  %v1487_v59 = vld [vmem:[%s1420_s23 + $0x28] sm:$0x3] }
  0x1d   : > { %453 = vrot.lane.b32.xlu2 %v374_v4, %s1281_s5  ;;  %v1481_v57 = vld [vmem:[%s1420_s23 + $0x10] sm:$0x3] }
  0x1e   : > { %v1484_v58 = vld [vmem:[%s1420_s23 + $0x50] sm:$0xff] }
  0x24   : > { %304 = vrot.lane.b32.xlu0 %v208_v0, %s1282_s10  ;;  %306 = vrot.lane.b32.xlu1 %v209_v2, %s1282_s10 }
  0x25   : > { %549 = vrot.lane.b32.xlu2 %v374_v4, %s1282_s10 }
  0x2c   : > { %310 = vrot.lane.b32.xlu0 %v211_v3, %s1282_s10  ;;  %451 = vrot.lane.b32.xlu1 %v373_v5, %s1281_s5 }
  0x2d   : > { %720 = vrot.lane.b32.xlu2 %v1384_v7, %s1281_s5 }
  0x34   : > { %449 = vrot.lane.b32.xlu0 %v372_v6, %s1281_s5  ;;  %547 = vrot.lane.b32.xlu1 %v373_v5, %s1282_s10 }
  0x35   : > { %814 = vrot.lane.b32.xlu2 %v1388_v9, %s1282_s10 }
  0x3c   : > { %455 = vrot.lane.b32.xlu0 %v375_v8, %s1281_s5  ;;  %718 = vrot.lane.b32.xlu1 %v1388_v9, %s1281_s5 }
  0x3d   : > { %820 = vrot.lane.b32.xlu2 %v1395_v10, %s1282_s10 }
  0x44   : > { %545 = vrot.lane.b32.xlu0 %v372_v6, %s1282_s10  ;;  %724 = vrot.lane.b32.xlu1 %v1395_v10, %s1281_s5 }
  0x45   : > { %s1413_s13 = spop %1090 }
  0x46   : > { %s1415_s14 = spop %1092 }
  0x47   : > { %s1422_s27 = spop %1094 }
  0x48   : > { %s1424_s28 = spop %1096 }
  0x4c   : > { %551 = vrot.lane.b32.xlu0 %v375_v8, %s1282_s10  ;;  %818 = vrot.lane.b32.xlu1 %v1402_v11, %s1282_s10 }
  0x54   : > { %722 = vrot.lane.b32.xlu0 %v1402_v11, %s1281_s5 }
  0x5c   : > { %816 = vrot.lane.b32.xlu0 %v1384_v7, %s1282_s10 }
  0x6f   : > { %v309_v16 = vpop.permute.xlu2 %308 }
  0x77   : > { %v454_v22 = vpop.permute.xlu2 %453 }
  0x7f   : > { %v550_v26 = vpop.permute.xlu2 %549 }
  0x86   : > { %v237_v12 = vpop.permute.xlu0 %236  ;;  %v241_v13 = vpop.permute.xlu1 %240 }
  0x87   : > { %1098 = vpush %v237_v12  ;;  %v721_v32 = vpop.permute.xlu2 %720 }
  0x8e   : > { %v239_v14 = vpop.permute.xlu0 %238  ;;  %v243_v15 = vpop.permute.xlu1 %242 }
  0x8f   : > { %1100 = vpush %v239_v14  ;;  %v815_v43 = vpop.permute.xlu2 %814 }
  0x90   : > { %1102 = vpush %v241_v13 }
  0x91   : > { %1104 = vpush %v243_v15 }
  0x96   : > { %v305_v17 = vpop.permute.xlu0 %304  ;;  %v307_v18 = vpop.permute.xlu1 %306 }
  0x97   : > { %1106 = vpush %v305_v17 }
  0x98   : > { %1108 = vpush %v307_v18 }
  0x99   : > { %1110 = vpush %v309_v16 }
  0x9e   : > { %v311_v19 = vpop.permute.xlu0 %310  ;;  %v452_v20 = vpop.permute.xlu1 %451 }
  0x9f   : > { %1112 = vpush %v311_v19 }
  0xa0   : > { %1114 = vpush %v372_v6 }
  0xa1   : > { %1116 = vpush %v373_v5  ;;  %v1499_v5 = vld [vmem:[%s1420_s23 + $0x40] sm:$0x3] }
  0xa2   : > { %1118 = vpush %v374_v4 }
  0xa3   : > { %1120 = vpush %v375_v8 }
  0xa6   : > { %v450_v21 = vpop.permute.xlu0 %449  ;;  %v548_v24 = vpop.permute.xlu1 %547 }
  0xa7   : > { %1122 = vpush %v450_v21 }
  0xa8   : > { %1124 = vpush %v452_v20 }
  0xa9   : > { %1126 = vpush %v454_v22 }
  0xae   : > { %v456_v23 = vpop.permute.xlu0 %455  ;;  %v719_v30 = vpop.permute.xlu1 %718 }
  0xaf   : > { %1128 = vpush %v456_v23 }
  0xb6   : > { %v546_v25 = vpop.permute.xlu0 %545  ;;  %v725_v41 = vpop.permute.xlu1 %724 }
  0xb7   : > { %1130 = vpush %v546_v25 }
  0xb8   : > { %s1099_s29 = spop %1098  ;;  %1132 = vpush %v548_v24 }
  0xb9   : > { %v245_v28 = vstv %s1099_s29  ;;  %1134 = vpush %v550_v26 }
  0xba   : > { %v256_v29 = vmul.f32 %v245_v28, %v1427_v27  ;;  %v257_v39 = vmul.f32 %v245_v28, %v1438_v35 }
  0xbc   : > { %272 = vrot.lane.b32.xlu2 %v256_v29, %s1281_s5 }
  0xbe   : > { %v552_v31 = vpop.permute.xlu0 %551  ;;  %v819_v53 = vpop.permute.xlu1 %818 }
  0xbf   : > { %1136 = vpush %v552_v31 }
  0xc0   : > { %s1101_s30 = spop %1100  ;;  %1138 = vpush %v1388_v9 }
  0xc1   : > { %v248_v36 = vstv %s1101_s30  ;;  %s1103_s6 = spop %1102  ;;  %1140 = vpush %v1384_v7 }
  0xc2   : > { %v258_v37 = vmul.f32 %v248_v36, %v1432_v33  ;;  %v259_v38 = vmul.f32 %v248_v36, %v1435_v34  ;;  %s1444_s7 = spop %1104  ;;  %1142 = vpush %v1402_v11  ;;  %v251_v46 = vstv %s1103_s6  ;;  %v1504_v11 = vld [vmem:[%s1420_s23 + $0x58] sm:$0x3] }
  0xc3   : > { %1144 = vpush %v1395_v10  ;;  %v254_v40 = vstv %s1444_s7  ;;  %v261_v49 = vmul.f32 %v251_v46, %v1454_v44  ;;  %v260_v50 = vmul.f32 %v251_v46, %v1460_v47 }
  0xc4   : > { %278 = vrot.lane.b32.xlu1 %v259_v38, %s1281_s5  ;;  %276 = vrot.lane.b32.xlu0 %v258_v37, %s1281_s5  ;;  %1146 = vpush %v719_v30  ;;  %v262_v48 = vmul.f32 %v254_v40, %v1457_v45  ;;  %v263_v60 = vmul.f32 %v254_v40, %v1484_v58 }
  0xc5   : > { %274 = vrot.lane.b32.xlu2 %v257_v39, %s1281_s5  ;;  %1148 = vpush %v721_v32 }
  0xc6   : > { %v723_v42 = vpop.permute.xlu0 %722 }
  0xc7   : > { %1150 = vpush %v723_v42 }
  0xc8   : > { %s1463_s8 = spop %1106  ;;  %1152 = vpush %v725_v41  ;;  %v821_v41 = vpop.permute.xlu2 %820 }
  0xc9   : > { %1154 = vpush %v815_v43  ;;  %s1466_s9 = spop %1108  ;;  %v313_v51 = vstv %s1463_s8 }
  0xca   : > { %v316_v52 = vstv %s1466_s9  ;;  %s1474_s11 = spop %1110  ;;  %v324_v55 = vmul.f32 %v313_v51, %v1427_v27  ;;  %v325_v25 = vmul.f32 %v313_v51, %v1438_v35 }
  0xcb   : > { %v326_v56 = vmul.f32 %v316_v52, %v1432_v33  ;;  %v319_v7 = vstv %s1474_s11  ;;  %v327_v18 = vmul.f32 %v316_v52, %v1435_v34 }
  0xcc   : > { %284 = vrot.lane.b32.xlu1 %v262_v48, %s1281_s5  ;;  %282 = vrot.lane.b32.xlu0 %v261_v49, %s1281_s5  ;;  %v329_v19 = vmul.f32 %v319_v7, %v1454_v44  ;;  %v328_v46 = vmul.f32 %v319_v7, %v1460_v47 }
  0xcd   : > { %280 = vrot.lane.b32.xlu2 %v260_v50, %s1281_s5 }
  0xce   : > { %v817_v54 = vpop.permute.xlu0 %816 }
  0xcf   : > { %1156 = vpush %v817_v54 }
  0xd0   : > { %s1478_s12 = spop %1112  ;;  %1158 = vpush %v819_v53 }
  0xd1   : > { %s1115_s20 = spop %1114  ;;  %1160 = vpush %v821_v41  ;;  %v322_v48 = vstv %s1478_s12 }
  0xd2   : > { %v377_v61 = vstv %s1115_s20  ;;  %s1117_s22 = spop %1116 }
  0xd3   : > { %v388_v62 = vmul.f32 %v377_v61, %v1427_v27  ;;  %v389_v63 = vmul.f32 %v377_v61, %v1438_v35  ;;  %v390_v0 = vmul.f32 %v377_v61, %v1481_v57  ;;  %v380_v1 = vstv %s1117_s22  ;;  %s1119_s29 = spop %1118 }
  0xd4   : > { %344 = vrot.lane.b32.xlu0 %v326_v56, %s1282_s10  ;;  %340 = vrot.lane.b32.xlu1 %v324_v55, %s1282_s10  ;;  %v391_v2 = vmul.f32 %v380_v1, %v1432_v33  ;;  %v392_v3 = vmul.f32 %v380_v1, %v1435_v34  ;;  %v393_v4 = vmul.f32 %v380_v1, %v1487_v59  ;;  %v383_v6 = vstv %s1119_s29  ;;  %s1121_s30 = spop %1120 }
  0xd5   : > { %286 = vrot.lane.b32.xlu2 %v263_v60, %s1281_s5  ;;  %v413_v8 = vrot.slane %v388_v62, 1  ;;  %v414_v9 = vrot.slane %v389_v63, 1  ;;  %v416_v10 = vrot.slane %v390_v0, 1  ;;  %v394_v14 = vmul.f32 %v383_v6, %v1460_v47 }
  0xd6   : > { %v418_v12 = vrot.slane %v391_v2, 1  ;;  %v419_v13 = vrot.slane %v392_v3, 1  ;;  %v396_v15 = vmul.f32 %v383_v6, %v1499_v5  ;;  %v386_v16 = vstv %s1121_s30 }
  0xd7   : > { %v1509_v17 = vsel %vm412_vm0, %v414_v9, %v416_v10  ;;  %v395_v20 = vmul.f32 %v383_v6, %v1454_v44  ;;  %v399_v21 = vmul.f32 %v386_v16, %v1504_v11  ;;  %v398_v22 = vmul.f32 %v386_v16, %v1484_v58 }
  0xd8   : > { %s1123_s23 = spop %1122  ;;  %v1517_v23 = vsel %vm412_vm0, %v418_v12, %v419_v13  ;;  %v1520_v24 = vsel %vm412_vm0, %v413_v8, %v414_v9  ;;  %v423_v26 = vrot.slane %v394_v14, 1  ;;  %v397_v28 = vmul.f32 %v386_v16, %v1457_v45 }
  0xd9   : > { %s1125_s6 = spop %1124  ;;  %v424_v30 = vrot.slane %v395_v20, 1  ;;  %v426_v31 = vrot.slane %v396_v15, 1  ;;  %v429_v37 = vrot.slane %v398_v22, 1  ;;  %v431_v38 = vrot.slane %v399_v21, 1 }
  0xda   : > { %s1127_s7 = spop %1126  ;;  %v461_v29 = vstv %s1125_s6  ;;  %v458_v39 = vstv %s1123_s23  ;;  %v421_v49 = vrot.slane %v393_v4, 1  ;;  %v428_v50 = vrot.slane %v397_v28, 1 }
  0xdb   : > { %v472_v32 = vmul.f32 %v461_v29, %v1432_v33  ;;  %v473_v36 = vmul.f32 %v461_v29, %v1435_v34  ;;  %v464_v40 = vstv %s1127_s7  ;;  %v469_v51 = vmul.f32 %v458_v39, %v1427_v27 }
  0xdc   : > { %350 = vrot.lane.b32.xlu0 %v329_v19, %s1282_s10  ;;  %346 = vrot.lane.b32.xlu1 %v327_v18, %s1282_s10  ;;  %v470_v52 = vmul.f32 %v458_v39, %v1438_v35  ;;  %v1534_v53 = vmul.f32 %v464_v40, %v1454_v44  ;;  %v1537_v54 = vsel %vm412_vm0, %v423_v26, %v424_v30 }
  0xdd   : > { %342 = vrot.lane.b32.xlu2 %v325_v25, %s1282_s10  ;;  %v498_v42 = vrot.slane %v472_v32, 1  ;;  %v499_v43 = vrot.slane %v473_v36, 1  ;;  %v477_v56 = vmul.f32 %v464_v40, %v1499_v5  ;;  %v1542_v60 = vsel %vm412_vm0, %v424_v30, %v426_v31 }
  0xde   : > { %v1545_v61 = vsel %vm412_vm0, %v429_v37, %v431_v38  ;;  %v330_v62 = vmul.f32 %v322_v48, %v1457_v45  ;;  %v1549_v63 = vsel %vm412_vm0, %v419_v13, %v421_v49  ;;  %v1552_v0 = vsel %vm412_vm0, %v428_v50, %v429_v37 }
  0xdf   : > { %v500_v55 = vsel %vm412_vm0, %v498_v42, %v499_v43  ;;  %v493_v1 = vrot.slane %v469_v51, 1  ;;  %v494_v2 = vrot.slane %v470_v52, 1  ;;  %v504_v3 = vrot.slane %v1534_v53, 1 }
  0xe0   : > { %v506_v4 = vrot.slane %v477_v56, 1  ;;  %s1129_s8 = spop %1128  ;;  %v474_v6 = vmul.f32 %v461_v29, %v1487_v59  ;;  %v331_v13 = vmul.f32 %v322_v48, %v1484_v58  ;;  %v471_v14 = vmul.f32 %v458_v39, %v1481_v57 }
  0xe1   : > { %v495_v8 = vsel %vm412_vm0, %v493_v1, %v494_v2  ;;  %v467_v16 = vstv %s1129_s8  ;;  %v475_v31 = vmul.f32 %v464_v40, %v1460_v47 }
  0xe2   : > { %v507_v7 = vsel %vm412_vm0, %v504_v3, %v506_v4  ;;  %v501_v15 = vrot.slane %v474_v6, 1  ;;  %v496_v21 = vrot.slane %v471_v14, 1  ;;  %v478_v22 = vmul.f32 %v467_v16, %v1457_v45 }
  0xe3   : > { %v479_v25 = vmul.f32 %v467_v16, %v1484_v58  ;;  %v503_v40 = vrot.slane %v475_v31, 1  ;;  %v480_v51 = vmul.f32 %v467_v16, %v1504_v11 }
  0xe4   : > { %517 = vrot.lane.b32.xlu0 %v500_v55, %s1281_s5  ;;  %352 = vrot.lane.b32.xlu1 %v330_v62, %s1282_s10  ;;  %v502_v28 = vsel %vm412_vm0, %v499_v43, %v501_v15  ;;  %v508_v38 = vrot.slane %v478_v22, 1  ;;  %v497_v41 = vsel %vm412_vm0, %v494_v2, %v496_v21 }
  0xe5   : > { %348 = vrot.lane.b32.xlu2 %v328_v46, %s1282_s10  ;;  %v509_v39 = vrot.slane %v479_v25, 1  ;;  %v505_v2 = vsel %vm412_vm0, %v503_v40, %v504_v3 }
  0xe7   : > { %v510_v52 = vsel %vm412_vm0, %v508_v38, %v509_v39 }
  0xe8   : > { %s1131_s9 = spop %1130 }
  0xe9   : > { %v554_v9 = vstv %s1131_s9  ;;  %s1133_s11 = spop %1132 }
  0xea   : > { %v565_v10 = vmul.f32 %v554_v9, %v1427_v27  ;;  %v1563_v12 = vmul.f32 %v554_v9, %v1438_v35  ;;  %v1571_v20 = vstv %s1133_s11  ;;  %s1573_s12 = spop %1134  ;;  %v567_v55 = vmul.f32 %v554_v9, %v1481_v57 }
  0xeb   : > { %v1583_v29 = vmul.f32 %v1571_v20, %v1435_v34  ;;  %v570_v30 = vmul.f32 %v1571_v20, %v1487_v59  ;;  %v560_v6 = vstv %s1573_s12 }
  0xec   : > { %523 = vrot.lane.b32.xlu0 %v507_v7, %s1281_s5  ;;  %513 = vrot.lane.b32.xlu1 %v495_v8, %s1281_s5  ;;  %v589_v18 = vrot.slane %v565_v10, 1  ;;  %v590_v19 = vrot.slane %v1563_v12, 1  ;;  %v511_v7 = vrot.slane %v480_v51, 1  ;;  %v592_v8 = vrot.slane %v567_v55, 1 }
  0xed   : > { %354 = vrot.lane.b32.xlu2 %v331_v13, %s1282_s10  ;;  %v595_v42 = vrot.slane %v1583_v29, 1  ;;  %v597_v43 = vrot.slane %v570_v30, 1  ;;  %v571_v3 = vmul.f32 %v560_v6, %v1460_v47  ;;  %v1629_v14 = vmul.f32 %v560_v6, %v1454_v44 }
  0xee   : > { %v591_v26 = vsel %vm412_vm0, %v589_v18, %v590_v19  ;;  %v512_v18 = vsel %vm412_vm0, %v509_v39, %v511_v7 }
  0xef   : > { %v598_v56 = vsel %vm412_vm0, %v595_v42, %v597_v43  ;;  %v599_v38 = vrot.slane %v571_v3, 1  ;;  %v600_v43 = vrot.slane %v1629_v14, 1 }
  0xf0   : > { %s1137_s20 = spop %1136 }
  0xf1   : > { %s1139_s22 = spop %1138  ;;  %v1596_v46 = vstv %s1137_s20 }
  0xf2   : > { %v646_v32 = vstv %s1139_s22  ;;  %s1141_s29 = spop %1140  ;;  %v574_v62 = vmul.f32 %v1596_v46, %v1457_v45  ;;  %v1614_v1 = vmul.f32 %v1596_v46, %v1484_v58  ;;  %v576_v14 = vmul.f32 %v1596_v46, %v1504_v11 }
  0xf3   : > { %v1589_v36 = vmul.f32 %v646_v32, %v1481_v57  ;;  %v649_v37 = vstv %s1141_s29  ;;  %s1143_s30 = spop %1142  ;;  %v657_v15 = vmul.f32 %v646_v32, %v1427_v27  ;;  %v658_v16 = vmul.f32 %v646_v32, %v1438_v35 }
  0xf4   : > { %609 = vrot.lane.b32.xlu0 %v591_v26, %s1282_s10  ;;  %519 = vrot.lane.b32.xlu1 %v502_v28, %s1281_s5  ;;  %v1599_v48 = vmul.f32 %v649_v37, %v1487_v59  ;;  %v652_v49 = vstv %s1143_s30  ;;  %s1145_s23 = spop %1144  ;;  %v604_v9 = vrot.slane %v574_v62, 1  ;;  %v605_v10 = vrot.slane %v1614_v1, 1 }
  0xf5   : > { %515 = vrot.lane.b32.xlu2 %v497_v41, %s1281_s5  ;;  %v1602_v50 = vmul.f32 %v652_v49, %v1499_v5  ;;  %v655_v53 = vstv %s1145_s23  ;;  %s1147_s6 = spop %1146  ;;  %v661_v21 = vmul.f32 %v649_v37, %v1435_v34  ;;  %v593_v28 = vsel %vm412_vm0, %v590_v19, %v592_v8 }
  0xf6   : > { %v1618_v4 = vmul.f32 %v655_v53, %v1504_v11  ;;  %v1625_v13 = vstv %s1147_s6  ;;  %s1641_s7 = spop %1148  ;;  %v606_v26 = vsel %vm412_vm0, %v604_v9, %v605_v10  ;;  %v663_v30 = vmul.f32 %v652_v49, %v1460_v47 }
  0xf7   : > { %v1637_v22 = vmul.f32 %v1625_v13, %v1438_v35  ;;  %v740_v25 = vmul.f32 %v1625_v13, %v1481_v57  ;;  %v664_v31 = vmul.f32 %v652_v49, %v1454_v44  ;;  %v568_v32 = vmul.f32 %v1571_v20, %v1432_v33 }
  0xf8   : > { %v666_v39 = vmul.f32 %v655_v53, %v1457_v45  ;;  %v667_v41 = vmul.f32 %v655_v53, %v1484_v58  ;;  %s1151_s8 = spop %1150  ;;  %v682_v40 = vrot.slane %v657_v15, 2  ;;  %v683_v51 = vrot.slane %v658_v16, 2 }
  0xf9   : > { %v660_v12 = vmul.f32 %v649_v37, %v1432_v33  ;;  %v685_v19 = vrot.slane %v1589_v36, 2  ;;  %v688_v49 = vrot.slane %v661_v21, 2  ;;  %v763_v20 = vrot.slane %v1637_v22, 2  ;;  %s1153_s9 = spop %1152 }
  0xfa   : > { %v690_v53 = vrot.slane %v1599_v48, 2  ;;  %v692_v55 = vrot.slane %v663_v30, 2  ;;  %v733_v62 = vstv %s1151_s8  ;;  %v697_v7 = vrot.slane %v666_v39, 2  ;;  %s1716_s11 = spop %1154 }
  0xfb   : > { %v698_v37 = vrot.slane %v667_v41, 2  ;;  %v687_v8 = vrot.slane %v660_v12, 2  ;;  %v695_v9 = vrot.slane %v1602_v50, 2  ;;  %v700_v3 = vrot.slane %v1618_v4, 2 }
  0xfc   : > { %615 = vrot.lane.b32.xlu0 %v598_v56, %s1282_s10  ;;  %525 = vrot.lane.b32.xlu1 %v510_v52, %s1281_s5  ;;  %v765_v52 = vrot.slane %v740_v25, 2  ;;  %v693_v56 = vrot.slane %v664_v31, 2  ;;  %v601_v36 = vsel %vm412_vm0, %v599_v38, %v600_v43  ;;  %v744_v15 = vmul.f32 %v733_v62, %v1460_v47 }
  0xfd   : > { %521 = vrot.lane.b32.xlu2 %v505_v2, %s1281_s5  ;;  %v594_v2 = vrot.slane %v568_v32, 1  ;;  %v1673_v16 = vsel %vm681_vm1, %v682_v40, %v683_v51  ;;  %v1679_v50 = vsel %vm681_vm1, %v683_v51, %v685_v19  ;;  %v1682_v4 = vsel %vm681_vm1, %v688_v49, %v690_v53 }
  0xfe   : > { %v766_v48 = vsel %vm681_vm1, %v763_v20, %v765_v52  ;;  %v1685_v46 = vsel %vm681_vm1, %v692_v55, %v693_v56  ;;  %v1691_v25 = vsel %vm681_vm1, %v697_v7, %v698_v37  ;;  %v1698_v30 = vsel %vm681_vm1, %v687_v8, %v688_v49 }
  0xff   : > { %v596_v21 = vsel %vm412_vm0, %v594_v2, %v595_v42  ;;  %v1701_v31 = vsel %vm681_vm1, %v693_v56, %v695_v9  ;;  %v607_v32 = vrot.slane %v576_v14, 1  ;;  %v730_v29 = vstv %s1641_s7 }
 0x100   : > { %v772_v42 = vrot.slane %v744_v15, 2  ;;  %v736_v38 = vstv %s1153_s9  ;;  %v741_v41 = vmul.f32 %v730_v29, %v1432_v33  ;;  %v742_v40 = vmul.f32 %v730_v29, %v1435_v34  ;;  %s1157_s12 = spop %1156  ;;  %s1237_s9 = scalar_lea.hbm %s1887_s4, 128 }
 0x101   : > { %v608_v51 = vsel %vm412_vm0, %v605_v10, %v607_v32  ;;  %v748_v19 = vmul.f32 %v736_v38, %v1484_v58  ;;  %v749_v49 = vmul.f32 %v736_v38, %v1504_v11  ;;  %v1283_v52 = vmov 0   ;;  %s1159_s20 = spop %1158 }
 0x102   : > { %1206 = vset.pattern.permute.xlu0 %v1283_v52  ;;  %1207 = vset.pattern.permute.xlu1 %v1283_v52  ;;  %v738_v53 = vmul.f32 %v1625_v13, %v1427_v27  ;;  %v767_v10 = vrot.slane %v741_v41, 2  ;;  %v768_v55 = vrot.slane %v742_v40, 2  ;;  %v826_v8 = vstv %s1157_s12  ;;  %s1161_s22 = spop %1160 }
 0x103   : > { %1208 = vset.pattern.permute.xlu2 %v1283_v52  ;;  %v778_v56 = vrot.slane %v748_v19, 2  ;;  %v780_v2 = vrot.slane %v749_v49, 2  ;;  %v746_v13 = vmul.f32 %v733_v62, %v1499_v5  ;;  %v823_v15 = vstv %s1716_s11 }
 0x104   : > { %621 = vrot.lane.b32.xlu0 %v606_v26, %s1282_s10  ;;  %611 = vrot.lane.b32.xlu1 %v593_v28, %s1282_s10  ;;  %v573_v26 = vmul.f32 %v560_v6, %v1499_v5  ;;  %v1695_v28 = vsel %vm681_vm1, %v698_v37, %v700_v3  ;;  %v762_v7 = vrot.slane %v738_v53, 2  ;;  %v769_v3 = vsel %vm681_vm1, %v767_v10, %v768_v55 }
 0x105   : > { %527 = vrot.lane.b32.xlu2 %v512_v18, %s1281_s5  ;;  %v1676_v18 = vmul.f32 %v733_v62, %v1454_v44  ;;  %v781_v9 = vsel %vm681_vm1, %v778_v56, %v780_v2  ;;  %v775_v62 = vrot.slane %v746_v13, 2  ;;  %v834_v22 = vmul.f32 %v823_v15, %v1427_v27 }
 0x106   : > { %v602_v39 = vrot.slane %v573_v26, 1  ;;  %v764_v14 = vsel %vm681_vm1, %v762_v7, %v763_v20  ;;  %v829_v26 = vstv %s1159_s20  ;;  %v835_v20 = vmul.f32 %v823_v15, %v1438_v35 }
 0x107   : > { %v773_v6 = vrot.slane %v1676_v18, 2  ;;  %v841_v41 = vmul.f32 %v829_v26, %v1454_v44  ;;  %v842_v40 = vmul.f32 %v829_v26, %v1499_v5  ;;  %v858_v19 = vrot.slane %v834_v22, 2 }
 0x108   : > { %v603_v1 = vsel %vm412_vm0, %v600_v43, %v602_v39  ;;  %v838_v43 = vmul.f32 %v826_v8, %v1435_v34  ;;  %v859_v49 = vrot.slane %v835_v20, 2  ;;  %v839_v10 = vmul.f32 %v826_v8, %v1487_v59 }
 0x109   : > { %v774_v12 = vsel %vm681_vm1, %v772_v42, %v773_v6  ;;  %v869_v52 = vrot.slane %v841_v41, 2  ;;  %v871_v53 = vrot.slane %v842_v40, 2  ;;  %v226_v7 = vstv %s1424_s28 }
 0x10a   : > { %v866_v13 = vrot.slane %v839_v10, 2 }
 0x10b   : > { %v872_v5 = vsel %vm681_vm1, %v869_v52, %v871_v53 }
 0x10c   : > { %784 = vrot.lane.b32.xlu0 %v766_v48, %s1281_s5  ;;  %617 = vrot.lane.b32.xlu1 %v601_v36, %s1282_s10  ;;  %v837_v36 = vmul.f32 %v826_v8, %v1432_v33  ;;  %v743_v48 = vmul.f32 %v730_v29, %v1487_v59  ;;  %v776_v29 = vsel %vm681_vm1, %v773_v6, %v775_v62  ;;  %v832_v8 = vstv %s1161_s22  ;;  %s188_s22 = sand.u32 1, %s1271_s16  }
 0x10d   : > { %613 = vrot.lane.b32.xlu2 %v596_v21, %s1282_s10  ;;  %v864_v21 = vrot.slane %v838_v43, 2  ;;  %v235_v59 = vmul.f32 %v226_v7, %v1484_v58  ;;  %v214_v43 = vstv %s1413_s13  ;;  %v840_v62 = vmul.f32 %v829_v26, %v1460_v47  ;;  %v1211_v26 = vld [vmem:[%s1886_s3 + $0x1] ss:$0 sm:$0xff]  ;;  %s1081_s29 = sshll.u32 %s188_s22, 6  ;;  %s1000_s23 = scalar_lea.sflag [#allocation3], %s188_s22 }
 0x10e   : > { %v863_v18 = vrot.slane %v837_v36, 2  ;;  %v770_v42 = vrot.slane %v743_v48, 2  ;;  %v844_v48 = vmul.f32 %v832_v8, %v1484_v58  ;;  %s1830_s30 = scalar_lea.vmem [#allocation2], %s1081_s29 }
 0x110   : > { %v865_v39 = vsel %vm681_vm1, %v863_v18, %v864_v21  ;;  %v874_v22 = vrot.slane %v844_v48, 2 }
 0x114   : > { %790 = vrot.lane.b32.xlu0 %v774_v12, %s1281_s5  ;;  %623 = vrot.lane.b32.xlu1 %v608_v51, %s1282_s10  ;;  %v747_v51 = vmul.f32 %v736_v38, %v1457_v45  ;;  %v771_v12 = vsel %vm681_vm1, %v768_v55, %v770_v42  ;;  %v860_v38 = vsel %vm681_vm1, %v858_v19, %v859_v49 }
 0x115   : > { %619 = vrot.lane.b32.xlu2 %v603_v1, %s1282_s10  ;;  %v836_v55 = vmul.f32 %v823_v15, %v1481_v57  ;;  %v867_v57 = vsel %vm681_vm1, %v864_v21, %v866_v13  ;;  %v229_v15 = vmul.f32 %v214_v43, %v1438_v35  ;;  %v868_v21 = vrot.slane %v840_v62, 2 }
 0x116   : > { %v1724_v37 = vpop.permute.xlu2 %272  ;;  %v777_v6 = vrot.slane %v747_v51, 2  ;;  %v222_v35 = vstv %s1422_s27 }
 0x117   : > { %v870_v51 = vsel %vm681_vm1, %v868_v21, %v869_v52  ;;  %v232_v19 = vmul.f32 %v222_v35, %v1460_v47  ;;  %v1210_v47 = vld [vmem:[%s1885_s2 + $0x1] ss:$0 sm:$0xff]  ;;  %v233_v48 = vmul.f32 %v222_v35, %v1454_v44  ;;  %v1216_v35 = vld [vmem:[%s1886_s3 + $0x3] ss:$0 sm:$0xff] }
 0x118   : > { %v779_v2 = vsel %vm681_vm1, %v777_v6, %v778_v56  ;;  %v1209_v56 = vld [vmem:[%s1885_s2] ss:$0 sm:$0xff] }
 0x11c   : > { %796 = vrot.lane.b32.xlu0 %v781_v9, %s1281_s5  ;;  %786 = vrot.lane.b32.xlu1 %v769_v3, %s1281_s5  ;;  %v861_v3 = vrot.slane %v836_v55, 2 }
 0x11d   : > { %782 = vrot.lane.b32.xlu2 %v764_v14, %s1281_s5  ;;  %v843_v14 = vmul.f32 %v832_v8, %v1457_v45 }
 0x11e   : > { %v862_v18 = vsel %vm681_vm1, %v859_v49, %v861_v3  ;;  %v234_v49 = vmul.f32 %v226_v7, %v1457_v45 }
 0x11f   : > { %v275_v32 = vpop.permute.xlu2 %274  ;;  %v873_v42 = vrot.slane %v843_v14, 2 }
 0x120   : > { %v297_v20 = vadd.f32 %v275_v32, %v229_v15  ;;  %v845_v32 = vmul.f32 %v832_v8, %v1504_v11 }
 0x121   : > { %v875_v40 = vsel %vm681_vm1, %v873_v42, %v874_v22 }
 0x122   : > { %v876_v52 = vrot.slane %v845_v32, 2 }
 0x124   : > { %882 = vrot.lane.b32.xlu0 %v865_v39, %s1282_s10  ;;  %792 = vrot.lane.b32.xlu1 %v776_v29, %s1281_s5 }
 0x125   : > { %788 = vrot.lane.b32.xlu2 %v771_v12, %s1281_s5 }
 0x127   : > { %v281_v1 = vpop.permute.xlu2 %280 }
 0x128   : > { %v300_v53 = vadd.f32 %v281_v1, %v232_v19  ;;  %v877_v1 = vsel %vm681_vm1, %v874_v22, %v876_v52 }
 0x12c   : > { %888 = vrot.lane.b32.xlu0 %v872_v5, %s1282_s10  ;;  %878 = vrot.lane.b32.xlu1 %v860_v38, %s1282_s10 }
 0x12d   : > { %794 = vrot.lane.b32.xlu2 %v779_v2, %s1281_s5  ;;  %v218_v2 = vstv %s1415_s14  ;;  %s1088_s5 = sshll.u32 %s1332_s19, 6  ;;  %s1012_s19 = sshll.u32 %s1830_s30, 4  ;;  %s1013_s19 = int_to_ptr.vmem [resolvable:$true] %s1012_s19 }
 0x12e   : > { %v230_v45 = vmul.f32 %v218_v2, %v1432_v33  ;;  %v1213_v33 = vld [vmem:[%s1885_s2 + $0x2] ss:$0 sm:$0xff]  ;;  %v231_v14 = vmul.f32 %v218_v2, %v1435_v34  ;;  %v1215_v34 = vld [vmem:[%s1886_s3] ss:$0 sm:$0xff]  ;;  %s1011_s28 = scalar_lea.hbm %s1887_s4, %s1088_s5 }
 0x12f   : > { %v287_v9 = vpop.permute.xlu2 %286  ;;  %s1014_s14 = sshll.u32 %s1011_s28, 4  ;;  %s1015_s14 = int_to_ptr.hbm [resolvable:$true] %s1014_s14 }
 0x130   : > { %v303_v36 = vadd.f32 %v287_v9, %v235_v59  ;;  %s1231_s6 = sshra.s32 %s1015_s14, 4  ;;  %s1232_s6 = int_to_ptr.hbm [resolvable:$true] %s1231_s6 }
 0x131   : > { %s1233_s7 = scalar_lea.hbm %s1232_s6, 64  ;;  %p1238_p0 = scmp.lt.s32.totalorder %s1232_s6, %s1887_s4 }
 0x132   : > { %p1234_p11 = scmp.ne.s32.totalorder %s1232_s6, %s1233_s7  ;;  %p1239_p1 = scmp.lt.s32.totalorder %s1237_s9, %s1233_s7 }
 0x134   : > { %923 = vperm.xlu0 %1206, %v1209_v56   ;;  %884 = vrot.lane.b32.xlu1 %v867_v57, %s1282_s10  ;;  %p1235_p12 = pnand %p1234_p11, %p1349_p5  ;;  %p1240_p2 = por %p1239_p1, %p1238_p0 }
 0x135   : > { %880 = vrot.lane.b32.xlu2 %v862_v18, %s1282_s10 }
 0x136   : > { %v279_v39 = vpop.permute.xlu1 %278  ;;  %v277_v29 = vpop.permute.xlu0 %276  ;;  %p1236_p13 = pneg %p1235_p12 }
 0x137   : > { %v343_v41 = vpop.permute.xlu2 %342  ;;  %v298_v13 = vadd.f32 %v277_v29, %v230_v45 }
 0x138   : > { %v365_v58 = vadd.f32 %v343_v41, %v297_v20  ;;  %p1241_p3 = pnand %p1240_p2, %p1236_p13 }
 0x13a   : > { %v442_v12 = vadd.f32 %v1509_v17, %v365_v58  ;;  %v228_v17 = vmul.f32 %v214_v43, %v1427_v27  ;;  %v1212_v27 = vld [vmem:[%s1885_s2 + $0x3] ss:$0 sm:$0xff] }
 0x13c   : > { %890 = vrot.lane.b32.xlu1 %v875_v40, %s1282_s10  ;;  %963 = vperm.xlu0 %1206, %v1211_v26   ;;  %v296_v7 = vadd.f32 %v1724_v37, %v228_v17 }
 0x13d   : > { %886 = vrot.lane.b32.xlu2 %v870_v51, %s1282_s10 }
 0x13e   : > { %v285_v6 = vpop.permute.xlu1 %284  ;;  %v283_v10 = vpop.permute.xlu0 %282 }
 0x13f   : > { %v302_v5 = vadd.f32 %v285_v6, %v234_v49  ;;  %v349_v38 = vpop.permute.xlu2 %348  ;;  %v301_v62 = vadd.f32 %v283_v10, %v233_v48 }
 0x140   : > { %v368_v55 = vadd.f32 %v349_v38, %v300_v53 }
 0x142   : > { %v445_v11 = vadd.f32 %v1537_v54, %v368_v55 }
 0x144   : > { %927 = vperm.xlu1 %1207, %v1210_v47  }
 0x145   : > { %892 = vrot.lane.b32.xlu2 %v877_v1, %s1282_s10 }
 0x146   : > { %v345_v59 = vpop.permute.xlu0 %344  ;;  %v341_v8 = vpop.permute.xlu1 %340 }
 0x147   : > { %v366_v9 = vadd.f32 %v345_v59, %v298_v13  ;;  %v364_v3 = vadd.f32 %v341_v8, %v296_v7  ;;  %v355_v56 = vpop.permute.xlu2 %354 }
 0x148   : > { %v371_v57 = vadd.f32 %v355_v56, %v303_v36  ;;  %v299_v36 = vadd.f32 %v279_v39, %v231_v14 }
 0x149   : > { %v443_v54 = vadd.f32 %v1517_v23, %v366_v9  ;;  %v441_v37 = vadd.f32 %v1520_v24, %v364_v3  ;;  %v1214_v23 = vld [vmem:[%s1886_s3 + $0x2] ss:$0 sm:$0xff] }
 0x14a   : > { %v448_v43 = vadd.f32 %v1545_v61, %v371_v57 }
 0x14c   : > { %935 = vperm.xlu1 %1207, %v1212_v27  }
 0x14d   : > { %931 = vperm.xlu2 %1208, %v1213_v33  }
 0x14e   : > { %v351_v15 = vpop.permute.xlu0 %350  ;;  %v347_v18 = vpop.permute.xlu1 %346 }
 0x14f   : > { %v369_v42 = vadd.f32 %v351_v15, %v301_v62  ;;  %v367_v22 = vadd.f32 %v347_v18, %v299_v36  ;;  %v516_v20 = vpop.permute.xlu2 %515 }
 0x150   : > { %v538_v21 = vadd.f32 %v516_v20, %v442_v12 }
 0x151   : > { %v446_v44 = vadd.f32 %v1542_v60, %v369_v42  ;;  %v444_v24 = vadd.f32 %v1549_v63, %v367_v22 }
 0x154   : > { %967 = vperm.xlu1 %1207, %v1214_v23  }
 0x155   : > { %959 = vperm.xlu2 %1208, %v1215_v34  }
 0x156   : > { %v518_v61 = vpop.permute.xlu0 %517  ;;  %v353_v39 = vpop.permute.xlu1 %352 }
 0x157   : > { %v539_v29 = vadd.f32 %v518_v61, %v443_v54  ;;  %v370_v41 = vadd.f32 %v353_v39, %v302_v5  ;;  %v522_v58 = vpop.permute.xlu2 %521 }
 0x158   : > { %v541_v26 = vadd.f32 %v522_v58, %v445_v11 }
 0x159   : > { %v447_v40 = vadd.f32 %v1552_v0, %v370_v41 }
 0x15d   : > { %971 = vperm.xlu2 %1208, %v1216_v35  }
 0x15e   : > { %v524_v51 = vpop.permute.xlu0 %523  ;;  %v514_v12 = vpop.permute.xlu1 %513 }
 0x15f   : > { %v542_v60 = vadd.f32 %v524_v51, %v446_v44  ;;  %v537_v19 = vadd.f32 %v514_v12, %v441_v37  ;;  %v528_v63 = vpop.permute.xlu2 %527 }
 0x160   : > { %v544_v32 = vadd.f32 %v528_v63, %v448_v43 }
 0x166   : > { %v610_v49 = vpop.permute.xlu0 %609  ;;  %v520_v53 = vpop.permute.xlu1 %519 }
 0x167   : > { %v633_v6 = vadd.f32 %v610_v49, %v537_v19  ;;  %v540_v10 = vadd.f32 %v520_v53, %v444_v24  ;;  %v614_v5 = vpop.permute.xlu2 %613 }
 0x168   : > { %v635_v38 = vadd.f32 %v614_v5, %v539_v29 }
 0x169   : > { %v710_v2 = vadd.f32 %v1673_v16, %v633_v6 }
 0x16a   : > { %v712_v52 = vadd.f32 %v1698_v30, %v635_v38 }
 0x16e   : > { %v616_v55 = vpop.permute.xlu0 %615  ;;  %v526_v47 = vpop.permute.xlu1 %525 }
 0x16f   : > { %v636_v0 = vadd.f32 %v616_v55, %v540_v10  ;;  %v543_v11 = vadd.f32 %v526_v47, %v447_v40  ;;  %v620_v17 = vpop.permute.xlu2 %619 }
 0x170   : > { %v638_v45 = vadd.f32 %v620_v17, %v542_v60 }
 0x171   : > { %v713_v1 = vadd.f32 %v1682_v4, %v636_v0 }
 0x172   : > { %v1821_v7 = vadd.f32 %v1701_v31, %v638_v45 }
 0x176   : > { %v622_v13 = vpop.permute.xlu0 %621  ;;  %v612_v59 = vpop.permute.xlu1 %611 }
 0x177   : > { %v639_v8 = vadd.f32 %v622_v13, %v543_v11  ;;  %v634_v9 = vadd.f32 %v612_v59, %v538_v21  ;;  %v783_v3 = vpop.permute.xlu2 %782 }
 0x179   : > { %v711_v16 = vadd.f32 %v1679_v50, %v634_v9  ;;  %v716_v30 = vadd.f32 %v1691_v25, %v639_v8 }
 0x17e   : > { %v785_v56 = vpop.permute.xlu0 %784  ;;  %v618_v57 = vpop.permute.xlu1 %617 }
 0x17f   : > { %v637_v27 = vadd.f32 %v618_v57, %v541_v26  ;;  %v789_v33 = vpop.permute.xlu2 %788  ;;  %v807_v23 = vadd.f32 %v785_v56, %v711_v16 }
 0x180   : > { %v809_v40 = vadd.f32 %v789_v33, %v713_v1 }
 0x181   : > { %v714_v54 = vadd.f32 %v1685_v46, %v637_v27  ;;  %v806_v46 = vadd.f32 %v783_v3, %v710_v2 }
 0x186   : > { %v791_v37 = vpop.permute.xlu0 %790  ;;  %v624_v4 = vpop.permute.xlu1 %623 }
 0x187   : > { %v640_v43 = vadd.f32 %v624_v4, %v544_v32  ;;  %v795_v31 = vpop.permute.xlu2 %794  ;;  %v810_v45 = vadd.f32 %v791_v37, %v714_v54 }
 0x188   : > { %v812_v10 = vadd.f32 %v795_v31, %v716_v30 }
 0x189   : > { %v717_v14 = vadd.f32 %v1695_v28, %v640_v43 }
 0x18e   : > { %v797_v48 = vpop.permute.xlu0 %796  ;;  %v787_v36 = vpop.permute.xlu1 %786 }
 0x18f   : > { %v881_v62 = vpop.permute.xlu2 %880  ;;  %v808_v51 = vadd.f32 %v787_v36, %v712_v52  ;;  %v813_v5 = vadd.f32 %v797_v48, %v717_v14 }
 0x190   : > { %v903_v44 = vadd.f32 %v881_v62, %v807_v23 }
 0x196   : > { %v793_v15 = vpop.permute.xlu1 %792  ;;  %v883_v50 = vpop.permute.xlu0 %882 }
 0x197   : > { %v887_v25 = vpop.permute.xlu2 %886  ;;  %v904_v12 = vadd.f32 %v883_v50, %v808_v51  ;;  %v811_v1 = vadd.f32 %v793_v15, %v1821_v7 }
 0x198   : > { %v906_v8 = vadd.f32 %v887_v25, %v810_v45 }
 0x19e   : > { %v879_v18 = vpop.permute.xlu1 %878  ;;  %v889_v22 = vpop.permute.xlu0 %888 }
 0x19f   : > { %v893_v42 = vpop.permute.xlu2 %892  ;;  %v902_v24 = vadd.f32 %v879_v18, %v806_v46  ;;  %v907_v9 = vadd.f32 %v889_v22, %v811_v1 }
 0x1a0   : > { %v909_v52 = vadd.f32 %v893_v42, %v813_v5 }
 0x1a6   : > { %v885_v20 = vpop.permute.xlu1 %884  ;;  %v924_v34 = vpop.permute.xlu0 %923 }
 0x1a7   : > { %v932_v21 = vpop.permute.xlu2 %931  ;;  %v938_v61 = vmul.f32 %v924_v34, %v902_v24  ;;  %v939_v28 = vmul.f32 %v924_v34, %v903_v44  ;;  %v905_v60 = vadd.f32 %v885_v20, %v809_v40 }
 0x1a8   : > { %v942_v30 = vmul.f32 %v932_v21, %v906_v8  ;;  %v943_v56 = vmul.f32 %v932_v21, %v907_v9 }
 0x1ae   : > { %v891_v39 = vpop.permute.xlu1 %890  ;;  %v964_v63 = vpop.permute.xlu0 %963 }
 0x1af   : > { %v960_v29 = vpop.permute.xlu2 %959  ;;  %v908_v55 = vadd.f32 %v891_v39, %v812_v10 }
 0x1b0   : > { %v974_v41 = vadd.f32 %v960_v29, %v938_v61  ;;  %v975_v58 = vadd.f32 %v960_v29, %v939_v28 }
 0x1b2   : > { %v982_v26 = vmax.f32 %v974_v41, 0.0  ;;  %v983_v35 = vmax.f32 %v975_v58, 0.0 }
 0x1b4   : > { %991 = vst.msk [vmem:[%s1830_s30] sm:$0xff] %vm990_vm2, %v982_v26 }
 0x1b5   : > { %992 = vst.msk [vmem:[%s1830_s30 + $0x8] sm:$0xff] %vm990_vm2, %v983_v35 }
 0x1b6   : > { %v928_v19 = vpop.permute.xlu1 %927 }
 0x1b7   : > { %v940_v32 = vmul.f32 %v928_v19, %v904_v12  ;;  %v941_v49 = vmul.f32 %v928_v19, %v905_v60  ;;  %v972_v17 = vpop.permute.xlu2 %971 }
 0x1b9   : > { %v976_v53 = vadd.f32 %v964_v63, %v940_v32  ;;  %v977_v6 = vadd.f32 %v964_v63, %v941_v49 }
 0x1bb   : > { %v984_v38 = vmax.f32 %v976_v53, 0.0  ;;  %v985_v2 = vmax.f32 %v977_v6, 0.0 }
 0x1bd   : > { %993 = vst.msk [vmem:[%s1830_s30 + $0x10] sm:$0xff] %vm990_vm2, %v984_v38 }
 0x1be   : > { %994 = vst.msk [vmem:[%s1830_s30 + $0x18] sm:$0xff] %vm990_vm2, %v985_v2  ;;  %v936_v47 = vpop.permute.xlu1 %935 }
 0x1bf   : > { %v944_v0 = vmul.f32 %v936_v47, %v908_v55  ;;  %v945_v11 = vmul.f32 %v936_v47, %v909_v52 }
 0x1c1   : > { %v980_v13 = vadd.f32 %v972_v17, %v944_v0  ;;  %v981_v59 = vadd.f32 %v972_v17, %v945_v11 }
 0x1c3   : > { %v988_v3 = vmax.f32 %v980_v13, 0.0  ;;  %v989_v16 = vmax.f32 %v981_v59, 0.0 }
 0x1c5   : > { %997 = vst.msk [vmem:[%s1830_s30 + $0x30] sm:$0xff] %vm990_vm2, %v988_v3 }
 0x1c6   : > { %998 = vst.msk [vmem:[%s1830_s30 + $0x38] sm:$0xff] %vm990_vm2, %v989_v16  ;;  %v968_v7 = vpop.permute.xlu1 %967 }
 0x1c7   : > { %v978_v57 = vadd.f32 %v968_v7, %v942_v30  ;;  %v979_v27 = vadd.f32 %v968_v7, %v943_v56 }
 0x1c9   : > { %v986_v33 = vmax.f32 %v978_v57, 0.0  ;;  %v987_v54 = vmax.f32 %v979_v27, 0.0 }
 0x1cb   : > { %995 = vst.msk [vmem:[%s1830_s30 + $0x20] sm:$0xff] %vm990_vm2, %v986_v33 }
 0x1cc   : > { %996 = vst.msk [vmem:[%s1830_s30 + $0x28] sm:$0xff] %vm990_vm2, %v987_v54 }
 0x1cd   : > { %1244 = shalt.err (!%p1241_p3)
}
 0x1ce   : > { %s1284_s20 = smov 128   ;;  %s1285_s22 = smov 8  }
 0x1cf   : > { %1162 = dma.vmem_to_hbm [thread:$0]  (%p1349_p5), %s1013_s19, 1024, %s1015_s14, %s1000_s23, %s1284_s20, %s1284_s20, %s1285_s22  }
 0x1d0 PF: > { %p1168_p4 = scmp.ge.s32.totalorder %s1279_s18, 2  ;;  %s1029_s29 = sand.u32 1, %s1267_s15  }
 0x1d1   : > { %s1030_s30 = scalar_lea.sflag [#allocation3], %s1029_s29 }
 0x1d2   : > { %p1165_p7 = pnand %p1168_p4, %p1353_p6 }
 0x1d4   : > { %p1166_p8 = pneg %p1165_p7 }
 0x1d6   : > { %1262 = dma.done.wait (%p1166_p8), %s1030_s30, 1024  }
 0x1d7   : > { %1264 = vsyncadd (%p1166_p8), %s1030_s30, 4294966272  ;;  %p14_p9 = scmp.ge.s32.totalorder %s1336_s21, 4   ;;  %s1890_s15 = smov %s1271_s16 }
 0x1d8   : > { %s1891_s16 = smov %s1275_s17  ;;  %s1892_s17 = smov %s1347_s24 }
 0x1d9   : > { %s1893_s18 = smov %s1336_s21  ;;  %16 = sbr.rel (!%p14_p9) target bundleno = 3 (0x3), region = 71 }
 0x1de   :  { %1036 = vsyncpa [#allocation3], 1 }
 0x1df   :  { %1038 = vsyncpa [#allocation3 + $0x1], 1 }

</bundles_post_ra>
